<compile_context>
chip_gen: v7x
topology: tpu7x:2x2x1
jax: 0.10.0
libtpu: 0.0.40
codegen_flags: <defaults>
</compile_context>

<pallas_src>
import functools

import jax
import jax.numpy as jnp
from jax.experimental import pallas as pl
from jax.experimental.pallas import tpu as pltpu


def _round_up(v, m):
    return (v + m - 1) // m * m


def _matryoshka_kernel(x_ref, w1_ref, b1_ref, g_ref, be_ref, w2_ref, b2_ref,
                       out_ref, *, d2):
    # --- base_transform ------------------------------------------------------
    # Dropout(0.1) -> identity (eval).  Linear(D, 2D): the f32 -> bf16 cast of
    # the x tile is fused here (no standalone XLA cast/pad pass over HBM);
    # MXU matmul with f32 accumulation.
    x = x_ref[...].astype(w1_ref.dtype)
    h = jnp.dot(x, w1_ref[...], preferred_element_type=jnp.float32) + b1_ref[...]
    # LeakyReLU (default negative_slope = 0.01).
    h = jnp.maximum(h, 0.01 * h)

    # LayerNorm(2D), eps=1e-5.  The kernel sees the logical feature width, so
    # plain mean/var over the last axis is exact (no pad-lane correction).
    mu = jnp.mean(h, axis=-1, keepdims=True)
    c = h - mu
    var = jnp.mean(c * c, axis=-1, keepdims=True)
    h = c * jax.lax.rsqrt(var + 1e-5) * g_ref[...] + be_ref[...]

    # --- block 0: Linear(2D, D) -----------------------------------------------
    # delta uses bf16(h) on the MXU while the L2 norm below uses f32 h --
    # a deliberate mixed-precision asymmetry covered by the test tolerance.
    delta = jnp.dot(h.astype(w2_ref.dtype), w2_ref[...],
                    preferred_element_type=jnp.float32) + b2_ref[...]

    # --- F.normalize(cat([h, delta]), p=2, dim=1, eps=1e-12) -------------------
    # rsqrt runs on the EUP; rsqrt(max(ssq, 1e-24)) == 1 / max(||x||, 1e-12).
    sumsq = (jnp.sum(h * h, axis=-1, keepdims=True)
             + jnp.sum(delta * delta, axis=-1, keepdims=True))
    inv_norm = jax.lax.rsqrt(jnp.maximum(sumsq, 1e-24))

    # Two slab stores into the unpadded (bt, 3D) output block (no post-kernel
    # concatenate).  All math above is row-wise, so garbage rows of a partial
    # last batch block are harmless: their writes are masked off.
    out_ref[:, :d2] = (h * inv_norm).astype(out_ref.dtype)
    out_ref[:, d2:] = (delta * inv_norm).astype(out_ref.dtype)


def matryoshka_forward(x, params, *, batch_tile=512, use_bf16=True):
    """Fused Matryoshka forward. Returns {dim: embedding} like the PyTorch module."""
    B, D = x.shape
    w1, b1, g, be, w2, b2 = params
    D2 = w1.shape[1]            # 2 * input_dim
    Dd = w2.shape[1]            # dim - prev_dim (== input_dim for levels=[D])
    out_dim = D2 + Dd

    # Batch tiling: cdiv grid with a masked partial last block.  Cap the tile
    # at ceil(B/2) (rounded to 8 sublanes) so there are >= 2 grid steps when
    # possible and the "parallel" batch axis shards across v7x's two TCs.
    bt = max(8, min(batch_tile, _round_up(pl.cdiv(B, 2), 8)))
    grid = (pl.cdiv(B, bt),)

    cdt = jnp.bfloat16 if use_bf16 else jnp.float32
    f32 = jnp.float32
    # Weights/biases keep their logical shapes (Mosaic pads in VMEM for free).
    # The bf16 weight cast is O(D^2), grid-invariant and tiny; for repeated
    # calls keep the params in bf16 up-front to drop it entirely.
    w1c, w2c = w1.astype(cdt), w2.astype(cdt)
    b1f, gf, bef, b2f = (b1.astype(f32), g.astype(f32),
                         be.astype(f32), b2.astype(f32))

    # VMEM budget: leave headroom under the physical capacity (v7x has only
    # 64 MiB per TC; 128 MiB parts may use more).
    try:
        vmem_cap = int(pltpu.get_tpu_info().vmem_capacity_bytes)
    except Exception:  # conservative fallback if the query is unavailable
        vmem_cap = 64 * 1024 * 1024
    vmem_limit = min(vmem_cap * 3 // 4, 100 * 1024 * 1024)

    w_item = 2 if use_bf16 else 4
    cost = pl.CostEstimate(
        flops=2 * B * D * D2 + 2 * B * D2 * Dd + 12 * B * out_dim,
        transcendentals=2 * B,
        bytes_accessed=(B * D * x.dtype.itemsize
                        + (D * D2 + D2 * Dd) * w_item
                        + 4 * (3 * D2 + Dd)
                        + B * out_dim * x.dtype.itemsize),
    )

    kernel = functools.partial(_matryoshka_kernel, d2=D2)

    # Output stays in x.dtype (f32) to match the PyTorch module; switch to
    # bfloat16 here to halve the dominant HBM write if downstream allows it.
    out = pl.pallas_call(
        kernel,
        out_shape=jax.ShapeDtypeStruct((B, out_dim), x.dtype),
        grid_spec=pltpu.PrefetchScalarGridSpec(
            num_scalar_prefetch=0,
            grid=grid,
            in_specs=[
                pl.BlockSpec((bt, D), lambda i: (i, 0)),     # x tile (cast in-kernel)
                pl.BlockSpec((D, D2), lambda i: (0, 0)),     # W1 (VMEM-resident)
                pl.BlockSpec((1, D2), lambda i: (0, 0)),     # b1
                pl.BlockSpec((1, D2), lambda i: (0, 0)),     # LN gamma
                pl.BlockSpec((1, D2), lambda i: (0, 0)),     # LN beta
                pl.BlockSpec((D2, Dd), lambda i: (0, 0)),    # W2 (VMEM-resident)
                pl.BlockSpec((1, Dd), lambda i: (0, 0)),     # b2
            ],
            out_specs=pl.BlockSpec((bt, out_dim), lambda i: (i, 0)),
        ),
        compiler_params=pltpu.CompilerParams(
            dimension_semantics=("parallel",),   # batch shards across TCs
            vmem_limit_bytes=vmem_limit,
        ),
        cost_estimate=cost,
    )(x, w1c, b1f, gf, bef, w2c, b2f)

    # Single nested embedding: cat([base(2D), delta(D)]), already L2-normalized.
    return {D: out}


def init_params(key, input_dim):
    """Deterministic parameter init matching the module's __init__ shapes."""
    d2 = 2 * input_dim
    k1, k2 = jax.random.split(key)
    w1 = jax.random.normal(k1, (input_dim, d2), jnp.float32) * 0.02
    b1 = jnp.zeros((1, d2), jnp.float32)
    gamma = jnp.ones((1, d2), jnp.float32)      # LayerNorm weight
    beta = jnp.zeros((1, d2), jnp.float32)      # LayerNorm bias
    w2 = jax.random.normal(k2, (d2, input_dim), jnp.float32) * 0.02
    b2 = jnp.zeros((1, input_dim), jnp.float32)
    return (w1, b1, gamma, beta, w2, b2)


def _reference_forward(x, params):
    """Pure-JAX f32 reference (mirrors the PyTorch eval-mode forward)."""
    w1, b1, g, be, w2, b2 = params
    h = x @ w1 + b1
    h = jnp.where(h >= 0.0, h, 0.01 * h)
    mu = jnp.mean(h, axis=-1, keepdims=True)
    var = jnp.mean((h - mu) ** 2, axis=-1, keepdims=True)
    h = (h - mu) / jnp.sqrt(var + 1e-5) * g + be
    delta = h @ w2 + b2
    full = jnp.concatenate([h, delta], axis=-1)
    nrm = jnp.sqrt(jnp.sum(full * full, axis=-1, keepdims=True))
    return full / jnp.maximum(nrm, 1e-12)


if __name__ == "__main__":
    B = 8
    INPUT_DIM = 32
    # dimension_levels = [INPUT_DIM] -> the single well-defined configuration.

    key = jax.random.PRNGKey(0)
    kx, kp = jax.random.split(key)
    x = jax.random.normal(kx, (B, INPUT_DIM), jnp.float32)
    params = init_params(kp, INPUT_DIM)

    out_dict = matryoshka_forward(x, params)
    out = jax.block_until_ready(out_dict[INPUT_DIM])

    ref = _reference_forward(x, params)
    assert out.shape == (B, 3 * INPUT_DIM), out.shape
    # bf16 MXU operands with f32 accumulation: compare at a relaxed tolerance.
    max_err = float(jnp.max(jnp.abs(out - ref)))
    assert jnp.allclose(out, ref, atol=2e-2, rtol=2e-2), max_err

    print("KERNEL_OK")
</pallas_src>

<mosaic_0001>
module attributes {stable_mosaic.version = 11 : i64} {
  func.func @_matryoshka_kernel(%arg0: i32, %arg1: memref<8x32xf32, #tpu.memory_space<vmem>>, %arg2: memref<32x64xbf16, #tpu.memory_space<vmem>>, %arg3: memref<1x64xf32, #tpu.memory_space<vmem>>, %arg4: memref<1x64xf32, #tpu.memory_space<vmem>>, %arg5: memref<1x64xf32, #tpu.memory_space<vmem>>, %arg6: memref<64x32xbf16, #tpu.memory_space<vmem>>, %arg7: memref<1x32xf32, #tpu.memory_space<vmem>>, %arg8: memref<8x96xf32, #tpu.memory_space<vmem>>) attributes {dimension_semantics = [#tpu.dimension_semantics<parallel>], iteration_bounds = array<i64: 1>, scalar_prefetch = 0 : i64, scratch_operands = 0 : i64, tpu.core_type = #tpu.core_type<tc>, window_params = [{transform_indices = @transform_0, window_bounds = array<i64: 8, 32>}, {pipeline_mode = #tpu.pipeline_mode<synchronous>, transform_indices = @transform_1, window_bounds = array<i64: 32, 64>}, {pipeline_mode = #tpu.pipeline_mode<synchronous>, transform_indices = @transform_2, window_bounds = array<i64: 1, 64>}, {pipeline_mode = #tpu.pipeline_mode<synchronous>, transform_indices = @transform_3, window_bounds = array<i64: 1, 64>}, {pipeline_mode = #tpu.pipeline_mode<synchronous>, transform_indices = @transform_4, window_bounds = array<i64: 1, 64>}, {pipeline_mode = #tpu.pipeline_mode<synchronous>, transform_indices = @transform_5, window_bounds = array<i64: 64, 32>}, {pipeline_mode = #tpu.pipeline_mode<synchronous>, transform_indices = @transform_6, window_bounds = array<i64: 1, 32>}, {transform_indices = @transform_7, window_bounds = array<i64: 8, 96>}]} {
    %c0 = arith.constant 0 : index
    %c0_0 = arith.constant 0 : index
    %0 = vector.load %arg1[%c0, %c0_0] : memref<8x32xf32, #tpu.memory_space<vmem>>, vector<8x32xf32>
    %1 = arith.truncf %0 : vector<8x32xf32> to vector<8x32xbf16>
    %c0_1 = arith.constant 0 : index
    %c0_2 = arith.constant 0 : index
    %2 = vector.load %arg2[%c0_1, %c0_2] : memref<32x64xbf16, #tpu.memory_space<vmem>>, vector<32x64xbf16>
    %cst = arith.constant dense<0.000000e+00> : vector<8x64xf32>
    %3 = tpu.matmul %1, %2, %cst {dimension_numbers = #tpu.dot_dimension_numbers<[1], [0], [0], [1], [0, 0, 1, 1], [], []>} : vector<8x32xbf16>, vector<32x64xbf16>, vector<8x64xf32> -> vector<8x64xf32>
    %c0_3 = arith.constant 0 : index
    %c0_4 = arith.constant 0 : index
    %4 = vector.load %arg3[%c0_3, %c0_4] : memref<1x64xf32, #tpu.memory_space<vmem>>, vector<1x64xf32>
    %5 = vector.broadcast %4 : vector<1x64xf32> to vector<8x64xf32>
    %6 = arith.addf %3, %5 : vector<8x64xf32>
    %cst_5 = arith.constant 0.00999999977 : f32
    %7 = vector.broadcast %cst_5 : f32 to vector<8x64xf32>
    %8 = arith.mulf %7, %6 : vector<8x64xf32>
    %9 = arith.maximumf %6, %8 : vector<8x64xf32>
    %cst_6 = arith.constant dense<0.000000e+00> : vector<8xf32>
    %10 = vector.multi_reduction <add>, %9, %cst_6 [1] : vector<8x64xf32> to vector<8xf32>
    %11 = vector.shape_cast %10 : vector<8xf32> to vector<8x1xf32>
    %cst_7 = arith.constant 6.400000e+01 : f32
    %12 = vector.broadcast %cst_7 : f32 to vector<8x1xf32>
    %13 = arith.divf %11, %12 : vector<8x1xf32>
    %14 = vector.broadcast %13 : vector<8x1xf32> to vector<8x64xf32>
    %15 = arith.subf %9, %14 : vector<8x64xf32>
    %16 = arith.mulf %15, %15 : vector<8x64xf32>
    %cst_8 = arith.constant dense<0.000000e+00> : vector<8xf32>
    %17 = vector.multi_reduction <add>, %16, %cst_8 [1] : vector<8x64xf32> to vector<8xf32>
    %18 = vector.shape_cast %17 : vector<8xf32> to vector<8x1xf32>
    %cst_9 = arith.constant 6.400000e+01 : f32
    %19 = vector.broadcast %cst_9 : f32 to vector<8x1xf32>
    %20 = arith.divf %18, %19 : vector<8x1xf32>
    %cst_10 = arith.constant 9.99999974E-6 : f32
    %21 = vector.broadcast %cst_10 : f32 to vector<8x1xf32>
    %22 = arith.addf %20, %21 : vector<8x1xf32>
    %23 = math.rsqrt %22 : vector<8x1xf32>
    %24 = vector.broadcast %23 : vector<8x1xf32> to vector<8x64xf32>
    %25 = arith.mulf %15, %24 : vector<8x64xf32>
    %c0_11 = arith.constant 0 : index
    %c0_12 = arith.constant 0 : index
    %26 = vector.load %arg4[%c0_11, %c0_12] : memref<1x64xf32, #tpu.memory_space<vmem>>, vector<1x64xf32>
    %27 = vector.broadcast %26 : vector<1x64xf32> to vector<8x64xf32>
    %28 = arith.mulf %25, %27 : vector<8x64xf32>
    %c0_13 = arith.constant 0 : index
    %c0_14 = arith.constant 0 : index
    %29 = vector.load %arg5[%c0_13, %c0_14] : memref<1x64xf32, #tpu.memory_space<vmem>>, vector<1x64xf32>
    %30 = vector.broadcast %29 : vector<1x64xf32> to vector<8x64xf32>
    %31 = arith.addf %28, %30 : vector<8x64xf32>
    %32 = arith.truncf %31 : vector<8x64xf32> to vector<8x64xbf16>
    %c0_15 = arith.constant 0 : index
    %c0_16 = arith.constant 0 : index
    %33 = vector.load %arg6[%c0_15, %c0_16] : memref<64x32xbf16, #tpu.memory_space<vmem>>, vector<64x32xbf16>
    %cst_17 = arith.constant dense<0.000000e+00> : vector<8x32xf32>
    %34 = tpu.matmul %32, %33, %cst_17 {dimension_numbers = #tpu.dot_dimension_numbers<[1], [0], [0], [1], [0, 0, 1, 1], [], []>} : vector<8x64xbf16>, vector<64x32xbf16>, vector<8x32xf32> -> vector<8x32xf32>
    %c0_18 = arith.constant 0 : index
    %c0_19 = arith.constant 0 : index
    %35 = vector.load %arg7[%c0_18, %c0_19] : memref<1x32xf32, #tpu.memory_space<vmem>>, vector<1x32xf32>
    %36 = vector.broadcast %35 : vector<1x32xf32> to vector<8x32xf32>
    %37 = arith.addf %34, %36 : vector<8x32xf32>
    %38 = arith.mulf %31, %31 : vector<8x64xf32>
    %cst_20 = arith.constant dense<0.000000e+00> : vector<8xf32>
    %39 = vector.multi_reduction <add>, %38, %cst_20 [1] : vector<8x64xf32> to vector<8xf32>
    %40 = vector.shape_cast %39 : vector<8xf32> to vector<8x1xf32>
    %41 = arith.mulf %37, %37 : vector<8x32xf32>
    %cst_21 = arith.constant dense<0.000000e+00> : vector<8xf32>
    %42 = vector.multi_reduction <add>, %41, %cst_21 [1] : vector<8x32xf32> to vector<8xf32>
    %43 = vector.shape_cast %42 : vector<8xf32> to vector<8x1xf32>
    %44 = arith.addf %40, %43 : vector<8x1xf32>
    %cst_22 = arith.constant 1.000000e-24 : f32
    %45 = vector.broadcast %cst_22 : f32 to vector<8x1xf32>
    %46 = arith.maximumf %44, %45 : vector<8x1xf32>
    %47 = math.rsqrt %46 : vector<8x1xf32>
    %48 = vector.broadcast %47 : vector<8x1xf32> to vector<8x64xf32>
    %49 = arith.mulf %31, %48 : vector<8x64xf32>
    %c0_23 = arith.constant 0 : index
    %c0_24 = arith.constant 0 : index
    %50 = vector.load %arg8[%c0_23, %c0_24] : memref<8x96xf32, #tpu.memory_space<vmem>>, vector<8x64xf32>
    tpu.vector_store %arg8[%c0_23, %c0_24], %49 {strides = array<i32>} : memref<8x96xf32, #tpu.memory_space<vmem>>, vector<8x64xf32>,
    %51 = vector.broadcast %47 : vector<8x1xf32> to vector<8x32xf32>
    %52 = arith.mulf %37, %51 : vector<8x32xf32>
    %c0_25 = arith.constant 0 : index
    %c64 = arith.constant 64 : index
    %53 = vector.load %arg8[%c0_25, %c64] : memref<8x96xf32, #tpu.memory_space<vmem>>, vector<8x32xf32>
    tpu.vector_store %arg8[%c0_25, %c64], %52 {strides = array<i32>} : memref<8x96xf32, #tpu.memory_space<vmem>>, vector<8x32xf32>,
    return
  }
  func.func @transform_0(%arg0: i32) -> (i32, i32) {
    %c0_i32 = arith.constant 0 : i32
    %c0_i32_0 = arith.constant 0 : i32
    return %arg0, %c0_i32 : i32, i32
  }
  func.func @transform_1(%arg0: i32) -> (i32, i32) {
    %c0_i32 = arith.constant 0 : i32
    %c0_i32_0 = arith.constant 0 : i32
    %c0_i32_1 = arith.constant 0 : i32
    return %c0_i32, %c0_i32_0 : i32, i32
  }
  func.func @transform_2(%arg0: i32) -> (i32, i32) {
    %c0_i32 = arith.constant 0 : i32
    %c0_i32_0 = arith.constant 0 : i32
    %c0_i32_1 = arith.constant 0 : i32
    return %c0_i32, %c0_i32_0 : i32, i32
  }
  func.func @transform_3(%arg0: i32) -> (i32, i32) {
    %c0_i32 = arith.constant 0 : i32
    %c0_i32_0 = arith.constant 0 : i32
    %c0_i32_1 = arith.constant 0 : i32
    return %c0_i32, %c0_i32_0 : i32, i32
  }
  func.func @transform_4(%arg0: i32) -> (i32, i32) {
    %c0_i32 = arith.constant 0 : i32
    %c0_i32_0 = arith.constant 0 : i32
    %c0_i32_1 = arith.constant 0 : i32
    return %c0_i32, %c0_i32_0 : i32, i32
  }
  func.func @transform_5(%arg0: i32) -> (i32, i32) {
    %c0_i32 = arith.constant 0 : i32
    %c0_i32_0 = arith.constant 0 : i32
    %c0_i32_1 = arith.constant 0 : i32
    return %c0_i32, %c0_i32_0 : i32, i32
  }
  func.func @transform_6(%arg0: i32) -> (i32, i32) {
    %c0_i32 = arith.constant 0 : i32
    %c0_i32_0 = arith.constant 0 : i32
    %c0_i32_1 = arith.constant 0 : i32
    return %c0_i32, %c0_i32_0 : i32, i32
  }
  func.func @transform_7(%arg0: i32) -> (i32, i32) {
    %c0_i32 = arith.constant 0 : i32
    %c0_i32_0 = arith.constant 0 : i32
    return %arg0, %c0_i32 : i32, i32
  }
}

</mosaic_0001>

<bundles_post_ra>
// kernel: tpu_custom_call.1
= control target key start
LH: loop header
LB: loop body
LE: loop exit
PB: predicated region body
PF: predicated region fallthrough
CT: control target
= control target key end

     0   :  { %v325_v1 = vmov 0.0   ;;  %vm326_vm0 = vmmov 0   ;;  %s421_s0 = inlined_call_operand.vmem [shape: f32[8,32], index: 0, kind: input, shape index: {}]   ;;  %s422_s1 = inlined_call_operand.vmem [shape: bf16[32,64], index: 1, kind: input, shape index: {}]   ;;  %s423_s2 = inlined_call_operand.vmem [shape: f32[1,64], index: 2, kind: input, shape index: {}]   ;;  %s424_s3 = inlined_call_operand.vmem [shape: f32[1,64], index: 3, kind: input, shape index: {}]   ;;  %s425_s4 = inlined_call_operand.vmem [shape: f32[1,64], index: 4, kind: input, shape index: {}]   ;;  %s426_s5 = inlined_call_operand.vmem [shape: bf16[64,32], index: 5, kind: input, shape index: {}]   ;;  %s427_s6 = inlined_call_operand.vmem [shape: f32[1,32], index: 6, kind: input, shape index: {}]   ;;  %s428_s7 = inlined_call_operand.hbm [shape: f32[8,96], index: 7, kind: output, shape index: {}]  }
   0x1   :  { %v291_v0 = vld [vmem:[%s422_s1] sm:$0xff]   ;;  %267 = vmatprep.subr.bf16.mxu0 %v325_v1  ;;  %275 = vmatprep.subr.bf16.mxu1 %v325_v1  ;;  %v292_v2 = vld [vmem:[%s422_s1 + $0x8] sm:$0xff]  }
   0x2   :  { %268 = vmatpush3.bf16.msra.mxu0 %v291_v0  ;;  %271 = vmatprep.mubr.msk.bf16.mxu0 %vm326_vm0, %v325_v1  ;;  %v28_v3 = vld [vmem:[%s421_s0] sm:$0xff] }
   0x3   :  { %269 = vmatprep.subr.bf16.mxu0 %v325_v1  ;;  %283 = vmatprep.mubr.msk.bf16.mxu1 %vm326_vm0, %v325_v1  ;;  %v29_v4 = vpack.c.bf16 %v28_v3, %v28_v3 }
   0x4   :  { %12 = vsyncpa [#allocation3], 0  ;;  %vm53_vm1 = vcmask 261120   ;;  %v247_v5 = vld [vmem:[%s423_s2] ss:$0 sm:$0xff]  ;;  %vm99_vm2 = vcmask 523264  }
   0x5   :  { %v293_v19 = vld [vmem:[%s426_s5] sm:$0xff]   ;;  %v294_v20 = vld [vmem:[%s426_s5 + $0x8] sm:$0xff]   ;;  %v295_v21 = vld [vmem:[%s426_s5 + $0x10] sm:$0xff]   ;;  %vm231_vm3 = vcmask 785920  }
   0x6   :  { %270 = vmatpush3.bf16.msra.mxu0 %v292_v2  ;;  %276 = vmatpush3.bf16.msra.mxu1 %v293_v19  ;;  %v296_v22 = vld [vmem:[%s426_s5 + $0x18] sm:$0xff]   ;;  %v251_v27 = vld [vmem:[%s424_s3] ss:$0 sm:$0xff]  ;;  %s327_s3 = smov 64  }
   0x7   :  { %277 = vmatprep.subr.bf16.mxu1 %v325_v1  ;;  %v252_v29 = vld [vmem:[%s425_s4] ss:$0 sm:$0xff]  ;;  %s328_s4 = smov [#allocation2]  }
   0x8   :  { %v253_v35 = vld [vmem:[%s427_s6] ss:$0 sm:$0xff]  ;;  %s239_s6 = sshll.u32 %s328_s4, 4  ;;  %s240_s6 = int_to_ptr.vmem [resolvable:$true] %s239_s6 }
   0x9   :  { %272 = vmatmul.mubr.msk.bf16.vlgmr.msra.gmra.mrb[0].mxu0 %vm53_vm1, %v29_v4  ;;  %s301_s19 = scalar_lea.vmem %s240_s6, 128  ;;  %p306_p1 = scmp.lt.s32.totalorder %s240_s6, %s240_s6 }
   0xa   :  { %278 = vmatpush3.bf16.msra.mxu1 %v294_v20  ;;  %p302_p0 = scmp.ne.s32.totalorder %s240_s6, %s301_s19  ;;  %p307_p2 = scmp.lt.s32.totalorder %s301_s19, %s301_s19 }
   0xb   :  { %279 = vmatprep.subr.bf16.mxu1 %v325_v1 }
   0xc   :  { %p308_p3 = por %p307_p2, %p306_p1 }
   0xe   :  { %280 = vmatpush3.bf16.msra.mxu1 %v295_v21  ;;  %p309_p4 = pnand %p308_p3, %p302_p0 }
   0xf   :  { %281 = vmatprep.subr.bf16.mxu1 %v325_v1 }
  0x12   :  { %282 = vmatpush3.bf16.msra.mxu1 %v296_v22 }
  0xdc   :  { %v91_v6 = vpop.f32.mrb[0].mxu0 }
  0xdd   :  { %v92_v7 = vadd.f32 %v247_v5, %v91_v6  ;;  %v273_v8 = vpop.f32.mrb[1].mxu0 }
  0xde   :  { %v94_v9 = vpop.f32.mrb[2].mxu0 }
  0xdf   :  { %v97_v10 = vmul.f32 0.01, %v92_v7  ;;  %v274_v11 = vpop.f32.mrb[3].mxu0 }
  0xe1   :  { %v98_v12 = vmax.f32 %v92_v7, %v97_v10 }
  0xe3   :  { %v100_v13 = vsel %vm99_vm2, %v98_v12, 0.0 }
  0xe4   :  { %101 = vadd.xlane.f32.xlu0 %v100_v13 }
 0x171   :  { %v102_v14 = vpop.xlane.xlu0 %101 }
 0x172   :  { %v104_v15 = vmul.f32 0.015625, %v102_v14 }
 0x174   :  { %v105_v16 = vsub.f32 %v98_v12, %v104_v15 }
 0x176   :  { %v106_v17 = vmul.f32 %v105_v16, %v105_v16 }
 0x178   :  { %v107_v18 = vsel %vm99_vm2, %v106_v17, 0.0 }
 0x179   :  { %108 = vadd.xlane.f32.xlu0 %v107_v18 }
 0x206   :  { %v109_v23 = vpop.xlane.xlu0 %108 }
 0x207   :  { %v110_v24 = vmul.f32 0.015625, %v109_v23 }
 0x209   :  { %v111_v25 = vadd.f32 1e-05, %v110_v24 }
 0x20b   :  { %297 = vrsqrt.f32 %v111_v25 }
 0x215   :  { %v298_v26 = vpop.eup %297 }
 0x216   :  { %v113_v28 = vmul.f32 %v298_v26, %v105_v16 }
 0x218   :  { %v121_v30 = vmul.f32 %v251_v27, %v113_v28 }
 0x21a   :  { %v129_v31 = vadd.f32 %v252_v29, %v121_v30 }
 0x21c   :  { %v130_v32 = vpack.c.bf16 %v129_v31, %v129_v31  ;;  %v213_v33 = vmul.f32 %v129_v31, %v129_v31 }
 0x21e   :  { %284 = vmatmul.mubr.msk.bf16.vlgmr.msra.gmra.mrb[0].mxu1 %vm99_vm2, %v130_v32  ;;  %v214_v34 = vsel %vm99_vm2, %v213_v33, 0.0 }
 0x21f   :  { %215 = vadd.xlane.f32.xlu1 %v214_v34 }
 0x2ac   :  { %v216_v43 = vpop.xlane.xlu1 %215 }
 0x2f1   :  { %v207_v36 = vpop.f32.mrb[0].mxu1 }
 0x2f2   :  { %v208_v37 = vadd.f32 %v253_v35, %v207_v36  ;;  %v285_v38 = vpop.f32.mrb[1].mxu1 }
 0x2f3   :  { %v210_v39 = vpop.f32.mrb[2].mxu1 }
 0x2f4   :  { %v286_v40 = vpop.f32.mrb[3].mxu1  ;;  %v217_v41 = vmul.f32 %v208_v37, %v208_v37 }
 0x2f6   :  { %v218_v42 = vsel %vm53_vm1, %v217_v41, 0.0 }
 0x2f7   :  { %219 = vadd.xlane.f32.xlu1 %v218_v42 }
 0x384   :  { %v220_v44 = vpop.xlane.xlu1 %219 }
 0x385   :  { %v221_v45 = vadd.f32 %v220_v44, %v216_v43 }
 0x387   :  { %v222_v46 = vmax.f32 %v221_v45, 1e-24 }
 0x389   :  { %299 = vrsqrt.f32 %v222_v46 }
 0x393   :  { %v300_v47 = vpop.eup %299 }
 0x394   :  { %v226_v48 = vmul.f32 %v300_v47, %v208_v37  ;;  %v224_v49 = vmul.f32 %v300_v47, %v129_v31 }
 0x396   :  { %228 = vrot.lane.b32.xlu0 %v226_v48, %s327_s3  ;;  %225 = vst.msk [vmem:[#allocation2] sm:$0xff] %vm99_vm2, %v224_v49 }
 0x408   :  { %v229_v50 = vpop.permute.xlu0 %228 }
 0x409   :  { %232 = vst.msk [vmem:[#allocation2] sm:$0xff] %vm231_vm3, %v229_v50 }
 0x40a   :  { %312 = shalt.err (!%p309_p4)
}
 0x40b   :  { %s313_s22 = scalar_lea.hbm %s428_s7, 128 }
 0x40c   :  { %p314_p5 = scmp.ne.s32.totalorder %s428_s7, %s313_s22  ;;  %p317_p6 = scmp.lt.u32.totalorder %s313_s22, %s428_s7 }
 0x40e   :  { %p319_p7 = pnand %p317_p6, %p314_p5 }
 0x410   :  { %322 = shalt.err (!%p319_p7)
}
 0x411   :  { %242 = dma.vmem_to_hbm [thread:$0]  %s240_s6, 128, %s428_s7, [#allocation3]  }
 0x412   :  { %323 = dma.done.wait [#allocation3], 128  }
 0x413   :  { %324 = vsyncadd [#allocation3], 4294967168 }
 0x414   :  { %246 = vsyncpa [#allocation3], 1 }

</bundles_post_ra>
